<compile_context>
chip_gen: v6e
topology: v6e:2x2x1
jax: 0.10.0
libtpu: 0.0.40
codegen_flags: <defaults>
</compile_context>

<pallas_src>
import functools
import math

import jax
import jax.numpy as jnp
from jax.experimental import pallas as pl
from jax.experimental.pallas import tpu as pltpu


def _round_up(x: int, m: int) -> int:
    return (x + m - 1) // m * m


def _flash_attn_kernel(q_ref, k_ref, v_ref, o_ref, m_sc, l_sc, acc_sc, *,
                       num_heads, scale, seq_len, mask_keys):
    """One (batch, q-tile, kv-tile) step of multi-head flash attention.

    Block shapes:
      q_ref, o_ref : (1, tq, D)      k_ref, v_ref : (1, tk, D)
    Scratch (persists across the innermost "arbitrary" KV grid axis):
      m_sc   : (tq, H) f32   running per-head row max
      l_sc   : (tq, D) f32   running per-head denominator, broadcast across each
                             head's hd-wide lane block (finalize = one divide)
      acc_sc : (tq, D) f32   lane-dense output accumulator (heads on lanes)
    """
    kv_i = pl.program_id(2)
    kv_n = pl.num_programs(2)

    tq = q_ref.shape[1]
    tk = k_ref.shape[1]
    d = q_ref.shape[2]
    hd = d // num_heads

    @pl.when(kv_i == 0)
    def _init():
        # -1e30 (not -inf) keeps alpha = exp(m_prev - m_new) finite in all cases.
        m_sc[...] = jnp.full(m_sc.shape, -1e30, dtype=jnp.float32)
        l_sc[...] = jnp.zeros(l_sc.shape, dtype=jnp.float32)
        acc_sc[...] = jnp.zeros(acc_sc.shape, dtype=jnp.float32)

    # Lane-dense (tile, D) loads; softmax scale folded into q once
    # (a tq x D multiply instead of scaling every (tq, tk) score tile).
    q_blk = q_ref[0].astype(jnp.float32) * scale     # (tq, D)
    k_blk = k_ref[0].astype(jnp.float32)             # (tk, D)
    v_blk = v_ref[0].astype(jnp.float32)             # (tk, D)

    if mask_keys:
        # Mask keys that only exist because S was padded up to the tile size.
        col = jax.lax.broadcasted_iota(jnp.int32, (1, tk), 1)
        key_valid = (kv_i * tk + col) < seq_len      # (1, tk)

    for h in range(num_heads):
        lo = h * hd
        qh = q_blk[:, lo:lo + hd]                    # (tq, hd)
        kh = k_blk[:, lo:lo + hd]                    # (tk, hd)
        vh = v_blk[:, lo:lo + hd]                    # (tk, hd)

        # Scores: contract the head dim directly (no materialized k.T).
        s = jax.lax.dot_general(
            qh, kh, dimension_numbers=(((1,), (1,)), ((), ())),
            preferred_element_type=jnp.float32)      # (tq, tk)
        if mask_keys:
            s = jnp.where(key_valid, s, jnp.float32(-1e30))

        # Online softmax update.
        m_prev = m_sc[:, h:h + 1]                    # (tq, 1)
        m_new = jnp.maximum(m_prev, jnp.max(s, axis=-1, keepdims=True))
        alpha = jnp.exp(m_prev - m_new)              # (tq, 1)
        p = jnp.exp(s - m_new)                       # (tq, tk)
        l_new = alpha * l_sc[:, lo:lo + 1] + jnp.sum(p, axis=-1, keepdims=True)

        pv = jax.lax.dot_general(
            p, vh, dimension_numbers=(((1,), (0,)), ((), ())),
            preferred_element_type=jnp.float32)      # (tq, hd)

        acc_sc[:, lo:lo + hd] = alpha * acc_sc[:, lo:lo + hd] + pv
        l_sc[:, lo:lo + hd] = jnp.broadcast_to(l_new, (tq, hd))
        m_sc[:, h:h + 1] = m_new

    @pl.when(kv_i == kv_n - 1)
    def _finalize():
        # Reference normalization exp / (sum(exp) + 1e-6), applied once per row
        # after the PV matmuls.  Single lane-dense (tq, D) store, no concat.
        o_ref[0] = (acc_sc[...] / (l_sc[...] + 1e-6)).astype(o_ref.dtype)


def _vmem_limit_bytes(tq, tk, d, itemsize=4):
    """Generous scoped-VMEM estimate: double-buffered blocks + scratch + temps."""
    lane = 128
    dp = _round_up(d, lane)
    tkp = _round_up(tk, lane)
    blocks = 2 * (2 * tq * dp + 2 * tk * dp) * itemsize   # q,o + k,v (double buffered)
    scratch = (tq * lane + 2 * tq * dp) * itemsize        # m + l + acc
    temps = 4 * tq * tkp * itemsize                       # score / p headroom
    est = blocks + scratch + temps + (2 << 20)
    return int(min(max(est, 32 << 20), 128 << 20))


def flash_attention_pallas(q, k, v, num_heads, *, block_q=256, block_k=256):
    """Multi-head attention over q, k, v of shape (B, S, D). Returns (B, S, D).

    Matches FlashAttention.forward(): no q/k/v/out projections (they are never
    applied in the PyTorch forward), no masks, dropout = 0,
    denominator = sum(exp) + 1e-6.
    """
    B, S, D = q.shape
    H = num_heads
    assert D % H == 0, "dim must be divisible by num_heads"
    assert block_q % 8 == 0 and block_k % 8 == 0
    hd = D // H
    scale = hd ** (-0.5)

    # --- Tile selection (review: fewer, fatter grid steps). ------------------
    # If the (8-padded) sequence fits one tile, collapse the Q and KV axes to a
    # single grid step per batch element; otherwise use the requested block
    # sizes and pad S up to a common multiple (padded keys masked in-kernel).
    s8 = _round_up(S, 8)
    if s8 <= block_q and s8 <= block_k:
        tq = tk = s8
    else:
        tq, tk = block_q, block_k
    s_pad = _round_up(s8, math.lcm(tq, tk))
    mask_keys = s_pad != S

    if s_pad != S:
        pad = ((0, 0), (0, s_pad - S), (0, 0))
        q = jnp.pad(q, pad)
        k = jnp.pad(k, pad)
        v = jnp.pad(v, pad)

    nq = s_pad // tq
    nk = s_pad // tk

    kernel = functools.partial(
        _flash_attn_kernel, num_heads=H, scale=scale, seq_len=S,
        mask_keys=mask_keys)

    out = pl.pallas_call(
        kernel,
        out_shape=jax.ShapeDtypeStruct((B, s_pad, D), q.dtype),
        grid_spec=pltpu.PrefetchScalarGridSpec(
            num_scalar_prefetch=0,
            grid=(B, nq, nk),
            in_specs=[
                pl.BlockSpec((1, tq, D), lambda b, qi, ki: (b, qi, 0)),   # q
                pl.BlockSpec((1, tk, D), lambda b, qi, ki: (b, ki, 0)),   # k
                pl.BlockSpec((1, tk, D), lambda b, qi, ki: (b, ki, 0)),   # v
            ],
            out_specs=pl.BlockSpec((1, tq, D), lambda b, qi, ki: (b, qi, 0)),
            scratch_shapes=[
                pltpu.VMEM((tq, H), jnp.float32),   # running max (per head)
                pltpu.VMEM((tq, D), jnp.float32),   # running denom (head-bcast)
                pltpu.VMEM((tq, D), jnp.float32),   # lane-dense output acc
            ],
        ),
        compiler_params=pltpu.CompilerParams(
            dimension_semantics=("parallel", "parallel", "arbitrary"),
            vmem_limit_bytes=_vmem_limit_bytes(tq, tk, D),
        ),
    )(q, k, v)

    if s_pad != S:
        out = out[:, :S, :]
    return out


def flash_attention_reference(q, k, v, num_heads):
    """Pure-JAX reference mirroring the PyTorch flash_attention exactly."""
    B, S, D = q.shape
    H = num_heads
    hd = D // H
    scale = hd ** (-0.5)
    qh = q.reshape(B, S, H, hd).transpose(0, 2, 1, 3)
    kh = k.reshape(B, S, H, hd).transpose(0, 2, 1, 3)
    vh = v.reshape(B, S, H, hd).transpose(0, 2, 1, 3)
    s = jnp.einsum("bhqd,bhkd->bhqk", qh, kh) * scale
    m = jnp.max(s, axis=-1, keepdims=True)
    e = jnp.exp(s - m)
    w = e / (jnp.sum(e, axis=-1, keepdims=True) + 1e-6)
    o = jnp.einsum("bhqk,bhkd->bhqd", w, vh)
    return o.transpose(0, 2, 1, 3).reshape(B, S, D)


if __name__ == "__main__":
    # Module-consistent small config: dim=32, num_heads=4 -> head_dim=8.
    B, D, H = 2, 32, 4
    key = jax.random.PRNGKey(0)

    # (S, block_q, block_k):
    #   S=8             -> single fused step per batch (tiny full-extent tiles)
    #   S=256           -> single fat step per batch (collapsed KV axis)
    #   S=256, blocks128 -> multiple q/kv tiles: exercises the online-softmax
    #                       init / accumulate / finalize across the KV axis
    #   S=300, blocks128 -> multi-tile + padded/masked keys (non-multiple S)
    cases = [(8, 256, 256), (256, 256, 256), (256, 128, 128), (300, 128, 128)]
    for S, bq, bk in cases:
        kq, kk, kv_ = jax.random.split(jax.random.fold_in(key, S * 1000 + bq), 3)
        q = jax.random.normal(kq, (B, S, D), dtype=jnp.float32)
        k = jax.random.normal(kk, (B, S, D), dtype=jnp.float32)
        v = jax.random.normal(kv_, (B, S, D), dtype=jnp.float32)

        out = flash_attention_pallas(q, k, v, num_heads=H, block_q=bq, block_k=bk)
        out = jax.block_until_ready(out)

        ref = flash_attention_reference(q, k, v, num_heads=H)
        assert out.shape == (B, S, D)
        assert jnp.allclose(out, ref, atol=1e-5, rtol=1e-5), \
            f"mismatch at S={S}, blocks=({bq},{bk})"

    print("KERNEL_OK")
</pallas_src>

<mosaic_0001>
module attributes {stable_mosaic.version = 11 : i64} {
  func.func @_flash_attn_kernel(%arg0: i32, %arg1: i32, %arg2: i32, %arg3: memref<1x8x32xf32, #tpu.memory_space<vmem>>, %arg4: memref<1x8x32xf32, #tpu.memory_space<vmem>>, %arg5: memref<1x8x32xf32, #tpu.memory_space<vmem>>, %arg6: memref<1x8x32xf32, #tpu.memory_space<vmem>>, %arg7: memref<8x4xf32, #tpu.memory_space<vmem>>, %arg8: memref<8x32xf32, #tpu.memory_space<vmem>>, %arg9: memref<8x32xf32, #tpu.memory_space<vmem>>) attributes {dimension_semantics = [#tpu.dimension_semantics<parallel>, #tpu.dimension_semantics<parallel>, #tpu.dimension_semantics<arbitrary>], iteration_bounds = array<i64: 2, 1, 1>, scalar_prefetch = 0 : i64, scratch_operands = 3 : i64, tpu.core_type = #tpu.core_type<tc>, window_params = [{transform_indices = @transform_0, window_bounds = array<i64: 1, 8, 32>}, {transform_indices = @transform_1, window_bounds = array<i64: 1, 8, 32>}, {transform_indices = @transform_2, window_bounds = array<i64: 1, 8, 32>}, {transform_indices = @transform_3, window_bounds = array<i64: 1, 8, 32>}]} {
    %c0_i32 = arith.constant 0 : i32
    %0 = arith.cmpi eq, %arg2, %c0_i32 : i32
    %1 = arith.extui %0 : i1 to i32
    %c0_i32_0 = arith.constant 0 : i32
    %2 = arith.cmpi ne, %1, %c0_i32_0 : i32
    scf.if %2 {
      %cst_69 = arith.constant -1.000000e+30 : f32
      %126 = vector.broadcast %cst_69 : f32 to vector<8x4xf32>
      %c0_70 = arith.constant 0 : index
      %c0_71 = arith.constant 0 : index
      %127 = vector.load %arg7[%c0_70, %c0_71] : memref<8x4xf32, #tpu.memory_space<vmem>>, vector<8x4xf32>
      tpu.vector_store %arg7[%c0_70, %c0_71], %126 {strides = array<i32>} : memref<8x4xf32, #tpu.memory_space<vmem>>, vector<8x4xf32>,
      %cst_72 = arith.constant 0.000000e+00 : f32
      %128 = vector.broadcast %cst_72 : f32 to vector<8x32xf32>
      %c0_73 = arith.constant 0 : index
      %c0_74 = arith.constant 0 : index
      %129 = vector.load %arg8[%c0_73, %c0_74] : memref<8x32xf32, #tpu.memory_space<vmem>>, vector<8x32xf32>
      tpu.vector_store %arg8[%c0_73, %c0_74], %128 {strides = array<i32>} : memref<8x32xf32, #tpu.memory_space<vmem>>, vector<8x32xf32>,
      %cst_75 = arith.constant 0.000000e+00 : f32
      %130 = vector.broadcast %cst_75 : f32 to vector<8x32xf32>
      %c0_76 = arith.constant 0 : index
      %c0_77 = arith.constant 0 : index
      %131 = vector.load %arg9[%c0_76, %c0_77] : memref<8x32xf32, #tpu.memory_space<vmem>>, vector<8x32xf32>
      tpu.vector_store %arg9[%c0_76, %c0_77], %130 {strides = array<i32>} : memref<8x32xf32, #tpu.memory_space<vmem>>, vector<8x32xf32>,
    } else {
    }
    %c0 = arith.constant 0 : index
    %c0_1 = arith.constant 0 : index
    %c0_2 = arith.constant 0 : index
    %3 = vector.load %arg3[%c0, %c0_1, %c0_2] : memref<1x8x32xf32, #tpu.memory_space<vmem>>, vector<1x8x32xf32>
    %4 = vector.shape_cast %3 : vector<1x8x32xf32> to vector<8x32xf32>
    %cst = arith.constant 0.353553385 : f32
    %5 = vector.broadcast %cst : f32 to vector<8x32xf32>
    %6 = arith.mulf %4, %5 : vector<8x32xf32>
    %c0_3 = arith.constant 0 : index
    %c0_4 = arith.constant 0 : index
    %c0_5 = arith.constant 0 : index
    %7 = vector.load %arg4[%c0_3, %c0_4, %c0_5] : memref<1x8x32xf32, #tpu.memory_space<vmem>>, vector<1x8x32xf32>
    %8 = vector.shape_cast %7 : vector<1x8x32xf32> to vector<8x32xf32>
    %c0_6 = arith.constant 0 : index
    %c0_7 = arith.constant 0 : index
    %c0_8 = arith.constant 0 : index
    %9 = vector.load %arg5[%c0_6, %c0_7, %c0_8] : memref<1x8x32xf32, #tpu.memory_space<vmem>>, vector<1x8x32xf32>
    %10 = vector.shape_cast %9 : vector<1x8x32xf32> to vector<8x32xf32>
    %11 = vector.extract_strided_slice %6 {offsets = [0, 0], sizes = [8, 8], strides = [1, 1]} : vector<8x32xf32> to vector<8x8xf32>
    %12 = vector.extract_strided_slice %8 {offsets = [0, 0], sizes = [8, 8], strides = [1, 1]} : vector<8x32xf32> to vector<8x8xf32>
    %13 = vector.extract_strided_slice %10 {offsets = [0, 0], sizes = [8, 8], strides = [1, 1]} : vector<8x32xf32> to vector<8x8xf32>
    %cst_9 = arith.constant dense<0.000000e+00> : vector<8x8xf32>
    %14 = tpu.matmul %11, %12, %cst_9 {dimension_numbers = #tpu.dot_dimension_numbers<[1], [1], [0], [0], [0, 0, 1, 0], [], []>} : vector<8x8xf32>, vector<8x8xf32>, vector<8x8xf32> -> vector<8x8xf32>
    %c0_10 = arith.constant 0 : index
    %c0_11 = arith.constant 0 : index
    %15 = vector.load %arg7[%c0_10, %c0_11] : memref<8x4xf32, #tpu.memory_space<vmem>>, vector<8x1xf32>
    %cst_12 = arith.constant dense<0xFF800000> : vector<8xf32>
    %16 = vector.multi_reduction <maximumf>, %14, %cst_12 [1] : vector<8x8xf32> to vector<8xf32>
    %17 = vector.shape_cast %16 : vector<8xf32> to vector<8x1xf32>
    %18 = arith.maximumf %15, %17 : vector<8x1xf32>
    %19 = arith.subf %15, %18 : vector<8x1xf32>
    %20 = math.exp %19 : vector<8x1xf32>
    %21 = vector.broadcast %18 : vector<8x1xf32> to vector<8x8xf32>
    %22 = arith.subf %14, %21 : vector<8x8xf32>
    %23 = math.exp %22 : vector<8x8xf32>
    %c0_13 = arith.constant 0 : index
    %c0_14 = arith.constant 0 : index
    %24 = vector.load %arg8[%c0_13, %c0_14] : memref<8x32xf32, #tpu.memory_space<vmem>>, vector<8x1xf32>
    %25 = arith.mulf %20, %24 : vector<8x1xf32>
    %cst_15 = arith.constant dense<0.000000e+00> : vector<8xf32>
    %26 = vector.multi_reduction <add>, %23, %cst_15 [1] : vector<8x8xf32> to vector<8xf32>
    %27 = vector.shape_cast %26 : vector<8xf32> to vector<8x1xf32>
    %28 = arith.addf %25, %27 : vector<8x1xf32>
    %cst_16 = arith.constant dense<0.000000e+00> : vector<8x8xf32>
    %29 = tpu.matmul %23, %13, %cst_16 {dimension_numbers = #tpu.dot_dimension_numbers<[1], [0], [0], [1], [0, 0, 1, 1], [], []>} : vector<8x8xf32>, vector<8x8xf32>, vector<8x8xf32> -> vector<8x8xf32>
    %c0_17 = arith.constant 0 : index
    %c0_18 = arith.constant 0 : index
    %30 = vector.load %arg9[%c0_17, %c0_18] : memref<8x32xf32, #tpu.memory_space<vmem>>, vector<8x8xf32>
    %31 = vector.broadcast %20 : vector<8x1xf32> to vector<8x8xf32>
    %32 = arith.mulf %31, %30 : vector<8x8xf32>
    %33 = arith.addf %32, %29 : vector<8x8xf32>
    %c0_19 = arith.constant 0 : index
    %c0_20 = arith.constant 0 : index
    %34 = vector.load %arg9[%c0_19, %c0_20] : memref<8x32xf32, #tpu.memory_space<vmem>>, vector<8x8xf32>
    tpu.vector_store %arg9[%c0_19, %c0_20], %33 {strides = array<i32>} : memref<8x32xf32, #tpu.memory_space<vmem>>, vector<8x8xf32>,
    %35 = vector.shape_cast %28 : vector<8x1xf32> to vector<8x1xf32>
    %36 = vector.broadcast %35 : vector<8x1xf32> to vector<8x8xf32>
    %c0_21 = arith.constant 0 : index
    %c0_22 = arith.constant 0 : index
    %37 = vector.load %arg8[%c0_21, %c0_22] : memref<8x32xf32, #tpu.memory_space<vmem>>, vector<8x8xf32>
    tpu.vector_store %arg8[%c0_21, %c0_22], %36 {strides = array<i32>} : memref<8x32xf32, #tpu.memory_space<vmem>>, vector<8x8xf32>,
    %c0_23 = arith.constant 0 : index
    %c0_24 = arith.constant 0 : index
    %38 = vector.load %arg7[%c0_23, %c0_24] : memref<8x4xf32, #tpu.memory_space<vmem>>, vector<8x1xf32>
    tpu.vector_store %arg7[%c0_23, %c0_24], %18 {strides = array<i32>} : memref<8x4xf32, #tpu.memory_space<vmem>>, vector<8x1xf32>,
    %39 = vector.extract_strided_slice %6 {offsets = [0, 8], sizes = [8, 8], strides = [1, 1]} : vector<8x32xf32> to vector<8x8xf32>
    %40 = vector.extract_strided_slice %8 {offsets = [0, 8], sizes = [8, 8], strides = [1, 1]} : vector<8x32xf32> to vector<8x8xf32>
    %41 = vector.extract_strided_slice %10 {offsets = [0, 8], sizes = [8, 8], strides = [1, 1]} : vector<8x32xf32> to vector<8x8xf32>
    %cst_25 = arith.constant dense<0.000000e+00> : vector<8x8xf32>
    %42 = tpu.matmul %39, %40, %cst_25 {dimension_numbers = #tpu.dot_dimension_numbers<[1], [1], [0], [0], [0, 0, 1, 0], [], []>} : vector<8x8xf32>, vector<8x8xf32>, vector<8x8xf32> -> vector<8x8xf32>
    %c0_26 = arith.constant 0 : index
    %c1 = arith.constant 1 : index
    %43 = vector.load %arg7[%c0_26, %c1] : memref<8x4xf32, #tpu.memory_space<vmem>>, vector<8x1xf32>
    %cst_27 = arith.constant dense<0xFF800000> : vector<8xf32>
    %44 = vector.multi_reduction <maximumf>, %42, %cst_27 [1] : vector<8x8xf32> to vector<8xf32>
    %45 = vector.shape_cast %44 : vector<8xf32> to vector<8x1xf32>
    %46 = arith.maximumf %43, %45 : vector<8x1xf32>
    %47 = arith.subf %43, %46 : vector<8x1xf32>
    %48 = math.exp %47 : vector<8x1xf32>
    %49 = vector.broadcast %46 : vector<8x1xf32> to vector<8x8xf32>
    %50 = arith.subf %42, %49 : vector<8x8xf32>
    %51 = math.exp %50 : vector<8x8xf32>
    %c0_28 = arith.constant 0 : index
    %c8 = arith.constant 8 : index
    %52 = vector.load %arg8[%c0_28, %c8] : memref<8x32xf32, #tpu.memory_space<vmem>>, vector<8x1xf32>
    %53 = arith.mulf %48, %52 : vector<8x1xf32>
    %cst_29 = arith.constant dense<0.000000e+00> : vector<8xf32>
    %54 = vector.multi_reduction <add>, %51, %cst_29 [1] : vector<8x8xf32> to vector<8xf32>
    %55 = vector.shape_cast %54 : vector<8xf32> to vector<8x1xf32>
    %56 = arith.addf %53, %55 : vector<8x1xf32>
    %cst_30 = arith.constant dense<0.000000e+00> : vector<8x8xf32>
    %57 = tpu.matmul %51, %41, %cst_30 {dimension_numbers = #tpu.dot_dimension_numbers<[1], [0], [0], [1], [0, 0, 1, 1], [], []>} : vector<8x8xf32>, vector<8x8xf32>, vector<8x8xf32> -> vector<8x8xf32>
    %c0_31 = arith.constant 0 : index
    %c8_32 = arith.constant 8 : index
    %58 = vector.load %arg9[%c0_31, %c8_32] : memref<8x32xf32, #tpu.memory_space<vmem>>, vector<8x8xf32>
    %59 = vector.broadcast %48 : vector<8x1xf32> to vector<8x8xf32>
    %60 = arith.mulf %59, %58 : vector<8x8xf32>
    %61 = arith.addf %60, %57 : vector<8x8xf32>
    %c0_33 = arith.constant 0 : index
    %c8_34 = arith.constant 8 : index
    %62 = vector.load %arg9[%c0_33, %c8_34] : memref<8x32xf32, #tpu.memory_space<vmem>>, vector<8x8xf32>
    tpu.vector_store %arg9[%c0_33, %c8_34], %61 {strides = array<i32>} : memref<8x32xf32, #tpu.memory_space<vmem>>, vector<8x8xf32>,
    %63 = vector.shape_cast %56 : vector<8x1xf32> to vector<8x1xf32>
    %64 = vector.broadcast %63 : vector<8x1xf32> to vector<8x8xf32>
    %c0_35 = arith.constant 0 : index
    %c8_36 = arith.constant 8 : index
    %65 = vector.load %arg8[%c0_35, %c8_36] : memref<8x32xf32, #tpu.memory_space<vmem>>, vector<8x8xf32>
    tpu.vector_store %arg8[%c0_35, %c8_36], %64 {strides = array<i32>} : memref<8x32xf32, #tpu.memory_space<vmem>>, vector<8x8xf32>,
    %c0_37 = arith.constant 0 : index
    %c1_38 = arith.constant 1 : index
    %66 = vector.load %arg7[%c0_37, %c1_38] : memref<8x4xf32, #tpu.memory_space<vmem>>, vector<8x1xf32>
    tpu.vector_store %arg7[%c0_37, %c1_38], %46 {strides = array<i32>} : memref<8x4xf32, #tpu.memory_space<vmem>>, vector<8x1xf32>,
    %67 = vector.extract_strided_slice %6 {offsets = [0, 16], sizes = [8, 8], strides = [1, 1]} : vector<8x32xf32> to vector<8x8xf32>
    %68 = vector.extract_strided_slice %8 {offsets = [0, 16], sizes = [8, 8], strides = [1, 1]} : vector<8x32xf32> to vector<8x8xf32>
    %69 = vector.extract_strided_slice %10 {offsets = [0, 16], sizes = [8, 8], strides = [1, 1]} : vector<8x32xf32> to vector<8x8xf32>
    %cst_39 = arith.constant dense<0.000000e+00> : vector<8x8xf32>
    %70 = tpu.matmul %67, %68, %cst_39 {dimension_numbers = #tpu.dot_dimension_numbers<[1], [1], [0], [0], [0, 0, 1, 0], [], []>} : vector<8x8xf32>, vector<8x8xf32>, vector<8x8xf32> -> vector<8x8xf32>
    %c0_40 = arith.constant 0 : index
    %c2 = arith.constant 2 : index
    %71 = vector.load %arg7[%c0_40, %c2] : memref<8x4xf32, #tpu.memory_space<vmem>>, vector<8x1xf32>
    %cst_41 = arith.constant dense<0xFF800000> : vector<8xf32>
    %72 = vector.multi_reduction <maximumf>, %70, %cst_41 [1] : vector<8x8xf32> to vector<8xf32>
    %73 = vector.shape_cast %72 : vector<8xf32> to vector<8x1xf32>
    %74 = arith.maximumf %71, %73 : vector<8x1xf32>
    %75 = arith.subf %71, %74 : vector<8x1xf32>
    %76 = math.exp %75 : vector<8x1xf32>
    %77 = vector.broadcast %74 : vector<8x1xf32> to vector<8x8xf32>
    %78 = arith.subf %70, %77 : vector<8x8xf32>
    %79 = math.exp %78 : vector<8x8xf32>
    %c0_42 = arith.constant 0 : index
    %c16 = arith.constant 16 : index
    %80 = vector.load %arg8[%c0_42, %c16] : memref<8x32xf32, #tpu.memory_space<vmem>>, vector<8x1xf32>
    %81 = arith.mulf %76, %80 : vector<8x1xf32>
    %cst_43 = arith.constant dense<0.000000e+00> : vector<8xf32>
    %82 = vector.multi_reduction <add>, %79, %cst_43 [1] : vector<8x8xf32> to vector<8xf32>
    %83 = vector.shape_cast %82 : vector<8xf32> to vector<8x1xf32>
    %84 = arith.addf %81, %83 : vector<8x1xf32>
    %cst_44 = arith.constant dense<0.000000e+00> : vector<8x8xf32>
    %85 = tpu.matmul %79, %69, %cst_44 {dimension_numbers = #tpu.dot_dimension_numbers<[1], [0], [0], [1], [0, 0, 1, 1], [], []>} : vector<8x8xf32>, vector<8x8xf32>, vector<8x8xf32> -> vector<8x8xf32>
    %c0_45 = arith.constant 0 : index
    %c16_46 = arith.constant 16 : index
    %86 = vector.load %arg9[%c0_45, %c16_46] : memref<8x32xf32, #tpu.memory_space<vmem>>, vector<8x8xf32>
    %87 = vector.broadcast %76 : vector<8x1xf32> to vector<8x8xf32>
    %88 = arith.mulf %87, %86 : vector<8x8xf32>
    %89 = arith.addf %88, %85 : vector<8x8xf32>
    %c0_47 = arith.constant 0 : index
    %c16_48 = arith.constant 16 : index
    %90 = vector.load %arg9[%c0_47, %c16_48] : memref<8x32xf32, #tpu.memory_space<vmem>>, vector<8x8xf32>
    tpu.vector_store %arg9[%c0_47, %c16_48], %89 {strides = array<i32>} : memref<8x32xf32, #tpu.memory_space<vmem>>, vector<8x8xf32>,
    %91 = vector.shape_cast %84 : vector<8x1xf32> to vector<8x1xf32>
    %92 = vector.broadcast %91 : vector<8x1xf32> to vector<8x8xf32>
    %c0_49 = arith.constant 0 : index
    %c16_50 = arith.constant 16 : index
    %93 = vector.load %arg8[%c0_49, %c16_50] : memref<8x32xf32, #tpu.memory_space<vmem>>, vector<8x8xf32>
    tpu.vector_store %arg8[%c0_49, %c16_50], %92 {strides = array<i32>} : memref<8x32xf32, #tpu.memory_space<vmem>>, vector<8x8xf32>,
    %c0_51 = arith.constant 0 : index
    %c2_52 = arith.constant 2 : index
    %94 = vector.load %arg7[%c0_51, %c2_52] : memref<8x4xf32, #tpu.memory_space<vmem>>, vector<8x1xf32>
    tpu.vector_store %arg7[%c0_51, %c2_52], %74 {strides = array<i32>} : memref<8x4xf32, #tpu.memory_space<vmem>>, vector<8x1xf32>,
    %95 = vector.extract_strided_slice %6 {offsets = [0, 24], sizes = [8, 8], strides = [1, 1]} : vector<8x32xf32> to vector<8x8xf32>
    %96 = vector.extract_strided_slice %8 {offsets = [0, 24], sizes = [8, 8], strides = [1, 1]} : vector<8x32xf32> to vector<8x8xf32>
    %97 = vector.extract_strided_slice %10 {offsets = [0, 24], sizes = [8, 8], strides = [1, 1]} : vector<8x32xf32> to vector<8x8xf32>
    %cst_53 = arith.constant dense<0.000000e+00> : vector<8x8xf32>
    %98 = tpu.matmul %95, %96, %cst_53 {dimension_numbers = #tpu.dot_dimension_numbers<[1], [1], [0], [0], [0, 0, 1, 0], [], []>} : vector<8x8xf32>, vector<8x8xf32>, vector<8x8xf32> -> vector<8x8xf32>
    %c0_54 = arith.constant 0 : index
    %c3 = arith.constant 3 : index
    %99 = vector.load %arg7[%c0_54, %c3] : memref<8x4xf32, #tpu.memory_space<vmem>>, vector<8x1xf32>
    %cst_55 = arith.constant dense<0xFF800000> : vector<8xf32>
    %100 = vector.multi_reduction <maximumf>, %98, %cst_55 [1] : vector<8x8xf32> to vector<8xf32>
    %101 = vector.shape_cast %100 : vector<8xf32> to vector<8x1xf32>
    %102 = arith.maximumf %99, %101 : vector<8x1xf32>
    %103 = arith.subf %99, %102 : vector<8x1xf32>
    %104 = math.exp %103 : vector<8x1xf32>
    %105 = vector.broadcast %102 : vector<8x1xf32> to vector<8x8xf32>
    %106 = arith.subf %98, %105 : vector<8x8xf32>
    %107 = math.exp %106 : vector<8x8xf32>
    %c0_56 = arith.constant 0 : index
    %c24 = arith.constant 24 : index
    %108 = vector.load %arg8[%c0_56, %c24] : memref<8x32xf32, #tpu.memory_space<vmem>>, vector<8x1xf32>
    %109 = arith.mulf %104, %108 : vector<8x1xf32>
    %cst_57 = arith.constant dense<0.000000e+00> : vector<8xf32>
    %110 = vector.multi_reduction <add>, %107, %cst_57 [1] : vector<8x8xf32> to vector<8xf32>
    %111 = vector.shape_cast %110 : vector<8xf32> to vector<8x1xf32>
    %112 = arith.addf %109, %111 : vector<8x1xf32>
    %cst_58 = arith.constant dense<0.000000e+00> : vector<8x8xf32>
    %113 = tpu.matmul %107, %97, %cst_58 {dimension_numbers = #tpu.dot_dimension_numbers<[1], [0], [0], [1], [0, 0, 1, 1], [], []>} : vector<8x8xf32>, vector<8x8xf32>, vector<8x8xf32> -> vector<8x8xf32>
    %c0_59 = arith.constant 0 : index
    %c24_60 = arith.constant 24 : index
    %114 = vector.load %arg9[%c0_59, %c24_60] : memref<8x32xf32, #tpu.memory_space<vmem>>, vector<8x8xf32>
    %115 = vector.broadcast %104 : vector<8x1xf32> to vector<8x8xf32>
    %116 = arith.mulf %115, %114 : vector<8x8xf32>
    %117 = arith.addf %116, %113 : vector<8x8xf32>
    %c0_61 = arith.constant 0 : index
    %c24_62 = arith.constant 24 : index
    %118 = vector.load %arg9[%c0_61, %c24_62] : memref<8x32xf32, #tpu.memory_space<vmem>>, vector<8x8xf32>
    tpu.vector_store %arg9[%c0_61, %c24_62], %117 {strides = array<i32>} : memref<8x32xf32, #tpu.memory_space<vmem>>, vector<8x8xf32>,
    %119 = vector.shape_cast %112 : vector<8x1xf32> to vector<8x1xf32>
    %120 = vector.broadcast %119 : vector<8x1xf32> to vector<8x8xf32>
    %c0_63 = arith.constant 0 : index
    %c24_64 = arith.constant 24 : index
    %121 = vector.load %arg8[%c0_63, %c24_64] : memref<8x32xf32, #tpu.memory_space<vmem>>, vector<8x8xf32>
    tpu.vector_store %arg8[%c0_63, %c24_64], %120 {strides = array<i32>} : memref<8x32xf32, #tpu.memory_space<vmem>>, vector<8x8xf32>,
    %c0_65 = arith.constant 0 : index
    %c3_66 = arith.constant 3 : index
    %122 = vector.load %arg7[%c0_65, %c3_66] : memref<8x4xf32, #tpu.memory_space<vmem>>, vector<8x1xf32>
    tpu.vector_store %arg7[%c0_65, %c3_66], %102 {strides = array<i32>} : memref<8x4xf32, #tpu.memory_space<vmem>>, vector<8x1xf32>,
    %c0_i32_67 = arith.constant 0 : i32
    %123 = arith.cmpi eq, %arg2, %c0_i32_67 : i32
    %124 = arith.extui %123 : i1 to i32
    %c0_i32_68 = arith.constant 0 : i32
    %125 = arith.cmpi ne, %124, %c0_i32_68 : i32
    scf.if %125 {
      %c0_69 = arith.constant 0 : index
      %c0_70 = arith.constant 0 : index
      %126 = vector.load %arg9[%c0_69, %c0_70] : memref<8x32xf32, #tpu.memory_space<vmem>>, vector<8x32xf32>
      %c0_71 = arith.constant 0 : index
      %c0_72 = arith.constant 0 : index
      %127 = vector.load %arg8[%c0_71, %c0_72] : memref<8x32xf32, #tpu.memory_space<vmem>>, vector<8x32xf32>
      %cst_73 = arith.constant 9.99999997E-7 : f32
      %128 = vector.broadcast %cst_73 : f32 to vector<8x32xf32>
      %129 = arith.addf %127, %128 : vector<8x32xf32>
      %130 = arith.divf %126, %129 : vector<8x32xf32>
      %c0_74 = arith.constant 0 : index
      %c0_75 = arith.constant 0 : index
      %c0_76 = arith.constant 0 : index
      %131 = vector.load %arg6[%c0_74, %c0_75, %c0_76] : memref<1x8x32xf32, #tpu.memory_space<vmem>>, vector<1x8x32xf32>
      %132 = vector.shape_cast %131 : vector<1x8x32xf32> to vector<8x32xf32>
      %133 = vector.shape_cast %130 : vector<8x32xf32> to vector<1x8x32xf32>
      tpu.vector_store %arg6[%c0_74, %c0_75, %c0_76], %133 {strides = array<i32>} : memref<1x8x32xf32, #tpu.memory_space<vmem>>, vector<1x8x32xf32>,
    } else {
    }
    return
  }
  func.func @transform_0(%arg0: i32, %arg1: i32, %arg2: i32) -> (i32, i32, i32) {
    %c0_i32 = arith.constant 0 : i32
    %c0_i32_0 = arith.constant 0 : i32
    return %arg0, %arg1, %c0_i32 : i32, i32, i32
  }
  func.func @transform_1(%arg0: i32, %arg1: i32, %arg2: i32) -> (i32, i32, i32) {
    %c0_i32 = arith.constant 0 : i32
    %c0_i32_0 = arith.constant 0 : i32
    return %arg0, %arg2, %c0_i32 : i32, i32, i32
  }
  func.func @transform_2(%arg0: i32, %arg1: i32, %arg2: i32) -> (i32, i32, i32) {
    %c0_i32 = arith.constant 0 : i32
    %c0_i32_0 = arith.constant 0 : i32
    return %arg0, %arg2, %c0_i32 : i32, i32, i32
  }
  func.func @transform_3(%arg0: i32, %arg1: i32, %arg2: i32) -> (i32, i32, i32) {
    %c0_i32 = arith.constant 0 : i32
    %c0_i32_0 = arith.constant 0 : i32
    return %arg0, %arg1, %c0_i32 : i32, i32, i32
  }
}

</mosaic_0001>

<bundles_post_ra>
// kernel: tpu_custom_call.1
= control target key start
LH: loop header
LB: loop body
LE: loop exit
PB: predicated region body
PF: predicated region fallthrough
CT: control target
= control target key end

     0   :  { %s1986_s0 = inlined_call_operand.hbm [shape: f32[2,8,32], index: 0, kind: input, shape index: {}]   ;;  %s1987_s1 = inlined_call_operand.hbm [shape: f32[2,8,32], index: 1, kind: input, shape index: {}]   ;;  %s1988_s2 = inlined_call_operand.hbm [shape: f32[2,8,32], index: 2, kind: input, shape index: {}]   ;;  %s1989_s3 = inlined_call_operand.hbm [shape: f32[2,8,32], index: 3, kind: output, shape index: {}]  }
   0x1   :  { %1993 = sst [smem:[#allocation17_spill]] %s1987_s1 }
   0x2   :  { %8 = vsyncpa [#allocation6], 0 }
   0x3   :  { %10 = vsyncpa [#allocation6 + $0x1], 0 }
   0x4   :  { %11 = vsyncpa [#allocation9], 0 }
   0x5   :  { %13 = vsyncpa [#allocation9 + $0x1], 0 }
   0x6   :  { %14 = vsyncpa [#allocation7], 0 }
   0x7   :  { %16 = vsyncpa [#allocation7 + $0x1], 0  ;;  %s1664_s12 = smov 0   ;;  %s1666_s13 = smov 0  }
   0x8   :  { %s1668_s14 = smov 0   ;;  %s1670_s15 = smov 0  }
   0x9   :  { %s1672_s16 = smov 0   ;;  %s1674_s17 = smov 0  }
   0xa LB: > { %1994 = sst [smem:[#allocation15_spill]] %s1618_s16  ;;  %s1695_s18 = sadd.s32 4294967295, %s1622_s17   ;;  %s1622_s17 = sphi %s1674_s17, %s22_s17   ;;  %s1618_s16 = sphi %s1672_s16, %s2006_s16   ;;  %s1614_s15 = sphi %s1670_s15, %s2005_s15   ;;  %s1610_s14 = sphi %s1668_s14, %s2009_s14   ;;  %s1606_s13 = sphi %s1666_s13, %s2008_s13   ;;  %s1602_s12 = sphi %s1664_s12, %s2007_s12  }
   0xb   : > { %s1250_s19 = sadd.s32 4294967294, %s1622_s17   ;;  %s41_s20 = sadd.s32 1, %s1618_s16 }
   0xc   : > { %s50_s21 = sadd.s32 1, %s1610_s14  ;;  %p43_p0 = scmp.ge.s32.totalorder %s41_s20, 2 }
   0xd   : > { %p57_p1 = scmp.ne.s32.totalorder %s1610_s14, %s1606_s13  ;;  %p58_p2 = scmp.eq.s32.totalorder %s1622_s17, 0 }
   0xe   : > { %p63_p3 = scmp.ne.s32.totalorder %s1606_s13, %s1602_s12  ;;  %s2011_s20 = smov (%p43_p0, %s41_s20), 0 }
   0xf   : > { %1995 = sst [smem:[#allocation16_spill]] %s2011_s20  ;;  %p1707_p4 = por %p58_p2, %p57_p1 }
  0x10   : > { %p64_p5 = scmp.eq.s32.totalorder %s1695_s18, 0  ;;  %s45_s23 = ssub.s32 %s1618_s16, %s2011_s20 }
  0x11   : > { %p145_p6 = scmp.eq.s32.totalorder %s1695_s18, 1  ;;  %p48_p7 = scmp.eq.s32.totalorder %s45_s23, 0 }
  0x12   : > { %p1715_p8 = por %p64_p5, %p63_p3  ;;  %p151_p10 = scmp.eq.s32.totalorder %s1250_s19, 1 }
  0x13   : > { %p1719_p9 = por %p145_p6, %p57_p1  ;;  %p1358_p13 = scmp.lt.s32.totalorder %s1622_s17, 2 }
  0x14   : > { %s1724_s26 = scalar_select %p48_p7, %s1610_s14, %s50_s21  }
  0x15   : > { %p1726_p11 = por %p151_p10, %p63_p3  ;;  %s1990_s28 = sand.u32 1, %s1610_s14  }
  0x16   : > { %s1735_s29 = sshll.u32 %s1990_s28, 3  ;;  %s1738_s30 = sshll.u32 %s1618_s16, 7 }
  0x17   : > { %p1742_p0 = pnand %p1358_p13, %p1707_p4  ;;  %s190_s5 = sand.u32 1, %s1622_s17  }
  0x18   : > { %s2001_s1 = sld [smem:[#allocation17_spill]]  ;;  %s194_s9 = scalar_lea.vmem [#allocation8], %s1735_s29 }
  0x19   : > { %s202_s10 = sshll.u32 %s194_s9, 4  ;;  %p1259_p1 = scmp.ge.s32.totalorder %s1622_s17, 1  ;;  %s203_s10 = int_to_ptr.vmem [resolvable:$true] %s202_s10 }
  0x1a   : > { %p226_p2 = scmp.lt.s32.totalorder %s1622_s17, 3  ;;  %s1754_s11 = scalar_lea.sflag [#allocation9], %s190_s5 }
  0x1b   : > { %p1456_p3 = pneg %p1742_p0  ;;  %s1467_s19 = scalar_lea.vmem %s203_s10, 128 }
  0x1c   : > { %p1468_p4 = scmp.ne.s32.totalorder %s203_s10, %s1467_s19  ;;  %s1624_s21 = smov [#allocation8]  }
  0x1d   : > { %s1472_s22 = sshll.u32 %s1624_s21, 4  ;;  %s1473_s22 = int_to_ptr.vmem [resolvable:$false] %s1472_s22 }
  0x1e   : > { %s200_s8 = scalar_lea.hbm %s2001_s1, %s1738_s30  ;;  %p1470_p5 = pnand %p1468_p4, %p1456_p3 }
  0x1f   : > { %s1474_s23 = scalar_lea.vmem %s1473_s22, 256  ;;  %p1475_p7 = scmp.lt.s32.totalorder %s203_s10, %s1473_s22 }
  0x20   : > { %p1471_p6 = pneg %p1470_p5  ;;  %p1476_p10 = scmp.lt.s32.totalorder %s1474_s23, %s1467_s19 }
  0x22   : > { %p1477_p13 = por %p1476_p10, %p1475_p7 }
  0x24   : > { %p1478_p12 = pnand %p1477_p13, %p1471_p6 }
  0x26   : > { %1481 = shalt.err (!%p1478_p12)
}
  0x27   : > { %1350 = dma.hbm_to_vmem [thread:$0]  (!%p1742_p0), %s200_s8, 128, %s203_s10, %s1754_s11  }
  0x28   : > { %p1768_p4 = pnand %p1259_p1, %p226_p2  ;;  %s181_s9 = scalar_lea.hbm %s1986_s0, %s1738_s30 }
  0x29   : > { %s175_s19 = scalar_lea.vmem [#allocation5], %s1735_s29  ;;  %s219_s28 = scalar_lea.hbm %s1988_s2, %s1738_s30 }
  0x2a   : > { %s183_s21 = sshll.u32 %s175_s19, 4  ;;  %s2003_s1 = sand.u32 1, %s1610_s14   ;;  %s184_s21 = int_to_ptr.vmem [resolvable:$true] %s183_s21 }
  0x2b   : > { %s172_s20 = scalar_lea.sflag [#allocation6], %s2003_s1  ;;  %s1495_s8 = scalar_lea.vmem %s184_s21, 128 }
  0x2c   : > { %p1496_p12 = scmp.ne.s32.totalorder %s184_s21, %s1495_s8  ;;  %s1625_s10 = smov [#allocation5]  }
  0x2d   : > { %s1500_s16 = sshll.u32 %s1625_s10, 4  ;;  %s1501_s16 = int_to_ptr.vmem [resolvable:$false] %s1500_s16 }
  0x2e   : > { %p1498_p1 = pnand %p1496_p12, %p1456_p3  ;;  %s1502_s6 = scalar_lea.vmem %s1501_s16, 256 }
  0x2f   : > { %p1503_p5 = scmp.lt.s32.totalorder %s184_s21, %s1501_s16  ;;  %p1504_p6 = scmp.lt.s32.totalorder %s1502_s6, %s1495_s8 }
  0x30   : > { %p1499_p2 = pneg %p1498_p1 }
  0x31   : > { %p1505_p7 = por %p1504_p6, %p1503_p5 }
  0x33   : > { %p1506_p10 = pnand %p1505_p7, %p1499_p2 }
  0x35   : > { %1509 = shalt.err (!%p1506_p10)
}
  0x36   : > { %1347 = dma.hbm_to_vmem [thread:$0]  (!%p1742_p0), %s181_s9, 128, %s184_s21, %s172_s20  }
  0x37   : > { %s213_s1 = scalar_lea.vmem [#allocation10], %s1735_s29  ;;  %s1626_s22 = smov [#allocation10]  }
  0x38   : > { %s221_s7 = sshll.u32 %s213_s1, 4  ;;  %s1528_s16 = sshll.u32 %s1626_s22, 4  ;;  %s222_s7 = int_to_ptr.vmem [resolvable:$true] %s221_s7  ;;  %s1529_s16 = int_to_ptr.vmem [resolvable:$false] %s1528_s16 }
  0x39   : > { %s1523_s19 = scalar_lea.vmem %s222_s7, 128  ;;  %s1530_s23 = scalar_lea.vmem %s1529_s16, 256 }
  0x3a   : > { %p1524_p13 = scmp.ne.s32.totalorder %s222_s7, %s1523_s19  ;;  %p1531_p2 = scmp.lt.s32.totalorder %s222_s7, %s1529_s16 }
  0x3b   : > { %p1532_p5 = scmp.lt.s32.totalorder %s1530_s23, %s1523_s19 }
  0x3c   : > { %p1526_p12 = pnand %p1524_p13, %p1456_p3 }
  0x3d   : > { %p1533_p6 = por %p1532_p5, %p1531_p2 }
  0x3e   : > { %p1527_p1 = pneg %p1526_p12 }
  0x40   : > { %p1534_p7 = pnand %p1533_p6, %p1527_p1 }
  0x42   : > { %1537 = shalt.err (!%p1534_p7)
}
  0x43   : > { %1353 = dma.hbm_to_vmem [thread:$0]  (!%p1742_p0), %s219_s28, 128, %s222_s7, %s1754_s11  }
  0x44   : > { %230 = sbr.rel (%p1768_p4) target bundleno = 1847 (0x737), region = 32  ;;  %s1803_s9 = sand.u32 (!%p1768_p4), 1, %s1606_s13  }
  0x45   : > { %s1806_s21 = sshll.u32 (!%p1768_p4), %s1803_s9, 3  ;;  %s233_s4 = scalar_lea.sflag (!%p1768_p4), [#allocation6], %s1803_s9 }
  0x46   : > { %s236_s8 = scalar_lea.vmem (!%p1768_p4), [#allocation5], %s1806_s21 }
  0x49   : > { %1589 = dma.done.wait (%p1715_p8), %s233_s4, 128  }
  0x4a   : > { %1591 = vsyncadd (%p1715_p8), %s233_s4, 4294967168  ;;  %s241_s28 = sand.u32 1, %s1695_s18   ;;  %s245_s11 = scalar_lea.vmem [#allocation8], %s1806_s21 }
  0x4b   : > { %s242_s30 = scalar_lea.sflag [#allocation9], %s241_s28 }
  0x4c   : > { %1593 = dma.done.wait (%p1715_p8), %s242_s30, 256  }
  0x4d   : > { %1595 = vsyncadd (%p1715_p8), %s242_s30, 4294967040  ;;  %v1627_v0 = vmov 0.0   ;;  %vm1628_vm0 = vmmov 0   ;;  %vm300_vm1 = vcmask 64512   ;;  %v298_v1 = vld [vmem:[%s245_s11] sm:$0xff]  ;;  %v296_v2 = vld [vmem:[%s236_s8] sm:$0xff] }
  0x4e   : > { %1296 = vmatprep.subr.mxu0 %v1627_v0  ;;  %1298 = vmatprep.mubr.msk.f32.mxu0 %vm1628_vm0, %v1627_v0  ;;  %v297_v3 = vmul.f32 0.35355338, %v296_v2  ;;  %vm291_vm2 = vcmask 31744   ;;  %v1629_v4 = vmov -1e+30   ;;  %v1630_v8 = vmov 0  }
  0x4f   : > { %1301 = vmatprep.subr.mxu1 %v1627_v0  ;;  %1303 = vmatprep.mubr.msk.f32.mxu1 %vm1628_vm0, %v1627_v0  ;;  %292 = vst.msk [vmem:[#allocation2] sm:$0xff] %vm291_vm2, %v1629_v4  ;;  %s1631_s18 = smov 120   ;;  %vm293_vm3 = vcmask 261120   ;;  %s1632_s24 = smov 112   ;;  %vm487_vm4 = vcmask 7168   ;;  %v1634_v33 = vmov 1  }
  0x50   : > { %1297 = vmatpush3.xpose.msk.msra.mxu0 %vm300_vm1, %v298_v1  ;;  %1424 = vset.pattern.permute.xlu0 %v1630_v8  ;;  %294 = vst.msk [vmem:[#allocation3] sm:$0xff] %vm293_vm3, %v1627_v0  ;;  %295 = vst.msk [vmem:[#allocation4] sm:$0xff] %vm293_vm3, %v1627_v0  ;;  %s254_s5 = scalar_lea.vmem [#allocation10], %s1806_s21  ;;  %s1633_s10 = smov 104   ;;  %vm690_vm5 = vcmask 15368   ;;  %vm892_vm6 = vcmask 23568  }
  0x51   : > { %1311 = vmatprep.subr.mxu0 %v1627_v0  ;;  %491 = vrot.lane.b32.xlu1 %v298_v1, %s1631_s18  ;;  %v1842_v13 = vld [vmem:[%s254_s5] sm:$0xff]  ;;  %v1635_v49 = vmov 2   ;;  %s1636_s6 = smov 121   ;;  %vm1094_vm7 = vcmask 31768   ;;  %vm682_vm8 = vcmask 130112   ;;  %s1638_s1 = smov 114  }
  0x52   : > { %1302 = vmatpush3.msra.mxu1 %v1842_v13  ;;  %1425 = vset.pattern.permute.xlu1 %v1634_v33  ;;  %vm884_vm9 = vcmask 195712   ;;  %s1639_s7 = smov 107   ;;  %s1640_s19 = smov 8   ;;  %vm1086_vm10 = vcmask 261312  }
  0x53   : > { %1299 = vmatmul.mubr.msk.f32.vlgmr.msra.gmra.mxu0 %vm300_vm1, %v297_v3  ;;  %1306 = vmatprep.subr.mxu1 %v1627_v0  ;;  %s1641_s22 = smov 16   ;;  %s1642_s16 = smov 24  }
  0x54   : > { %1313 = vmatprep.mubr.msk.f32.mxu0 %vm1628_vm0, %v1627_v0  ;;  %s1277_s23 = sshll.u32 %s1614_s15, 7  ;;  %s286_s20 = scalar_lea.vmem [#allocation11], %s1806_s21 }
  0x55   : > { %489 = vrot.lane.b32.xlu1 %v297_v3, %s1631_s18  ;;  %s1121_s29 = sshll.u32 %s286_s20, 4  ;;  %s1119_s28 = scalar_lea.hbm %s1989_s3, %s1277_s23  ;;  %s1122_s29 = int_to_ptr.vmem [resolvable:$true] %s1121_s29 }
  0x56   : > { %v377_v9 = vld [vmem:[#allocation2] sm:$0xff]  ;;  %s1107_s30 = scalar_lea.sflag [#allocation7], %s1803_s9  ;;  %s1538_s11 = scalar_lea.vmem %s1122_s29, 128 }
  0x57   : > { %v393_v38 = vld [vmem:[#allocation3] sm:$0xff]  ;;  %p1539_p8 = scmp.ne.s32.totalorder %s1122_s29, %s1538_s11 }
  0x59   : > { %694 = vrot.lane.b32.xlu1 %v298_v1, %s1632_s24  ;;  %p1540_p0 = pnand %p1539_p8, %p1719_p9 }
  0x5b   : > { %p1541_p3 = pneg %p1540_p0 }
  0x5d   : > { %692 = vrot.lane.b32.xlu1 %v297_v3, %s1632_s24 }
  0x61   : > { %896 = vrot.lane.b32.xlu1 %v298_v1, %s1633_s10  ;;  %v1637_v1 = vmov 3  }
  0x65   : > { %894 = vrot.lane.b32.xlu1 %v297_v3, %s1633_s10 }
  0xc3   : > { %v492_v17 = vpop.permute.xlu1 %491 }
  0xc7   : > { %v490_v18 = vpop.permute.xlu1 %489 }
  0xcb   : > { %v695_v20 = vpop.permute.xlu1 %694 }
  0xcf   : > { %v693_v22 = vpop.permute.xlu1 %692 }
  0xd3   : > { %v897_v23 = vpop.permute.xlu1 %896 }
  0xd7   : > { %v895_v24 = vpop.permute.xlu1 %894 }
 0x113   : > { %v373_v5 = vpop.f32.mrf.mxu0 }
 0x114   : > { %v378_v6 = vsel %vm300_vm1, %v373_v5, -inf }
 0x115   : > { %379 = vmax.xlane.f32.xlu0 %v378_v6  ;;  %v1300_v7 = vpop.f32.mrf.mxu0 }
 0x19e   : > { %v380_v10 = vpop.xlane.xlu0 %379 }
 0x19f   : > { %v381_v11 = vmax.f32 %v377_v9, %v380_v10 }
 0x1a1   : > { %v382_v12 = vsub.f32 %v377_v9, %v381_v11  ;;  %488 = vst.msk [vmem:[#allocation2] sm:$0xff] %vm487_vm4, %v381_v11  ;;  %387 = vperm.xlu0 %1424, %v381_v11  }
 0x1a3   : > { %v383_v34 = vmul.f32 1.442695, %v382_v12 }
 0x1a5   : > { %1430 = vset.pattern.permute.xlu0 %v1635_v49 }
 0x1a8   : > { %v567_v36 = vld [vmem:[#allocation2] sm:$0xff] }
 0x21c   : > { %v388_v14 = vpop.permute.xlu0 %387 }
 0x21d   : > { %v390_v15 = vsub.f32 %v373_v5, %v388_v14 }
 0x21f   : > { %v391_v16 = vmul.f32 1.442695, %v390_v15 }
 0x221   : > { %1436 = vpow2.f32 %v391_v16 }
 0x222   : > { %1438 = vpow2.f32 %v383_v34 }
 0x22e   : > { %v1437_v19 = vpop.eup %1436 }
 0x22f   : > { %1304 = vmatmul.mubr.msk.f32.vlgmr.msra.gmra.mxu1 %vm300_vm1, %v1437_v19  ;;  %v395_v21 = vsel %vm300_vm1, %v1437_v19, 0.0  ;;  %v1872_v37 = vpop.eup %1438 }
 0x230   : > { %1307 = vmatpush3.xpose.msk.msra.mxu1 %vm300_vm1, %v492_v17  ;;  %396 = vadd.xlane.f32.xlu0 %v395_v21  ;;  %v394_v42 = vmul.f32 %v1872_v37, %v393_v38 }
 0x231   : > { %1308 = vmatprep.mubr.msk.f32.mxu1 %vm1628_vm0, %v1627_v0  ;;  %1316 = vmatprep.subr.mxu1 %v1627_v0 }
 0x233   : > { %1309 = vmatmul.mubr.msk.f32.vlgmr.msra.gmra.mxu1 %vm300_vm1, %v490_v18 }
 0x234   : > { %1317 = vmatpush3.xpose.msk.msra.mxu1 %vm300_vm1, %v695_v20  ;;  %1318 = vmatprep.mubr.msk.f32.mxu1 %vm1628_vm0, %v1627_v0 }
 0x235   : > { %1326 = vmatprep.subr.mxu1 %v1627_v0 }
 0x237   : > { %1319 = vmatmul.mubr.msk.f32.vlgmr.msra.gmra.mxu1 %vm300_vm1, %v693_v22 }
 0x238   : > { %1328 = vmatprep.mubr.msk.f32.mxu1 %vm1628_vm0, %v1627_v0  ;;  %1327 = vmatpush3.xpose.msk.msra.mxu1 %vm300_vm1, %v897_v23 }
 0x23b   : > { %1329 = vmatmul.mubr.msk.f32.vlgmr.msra.gmra.mxu1 %vm300_vm1, %v895_v24 }
 0x2b9   : > { %v397_v40 = vpop.xlane.xlu0 %396 }
 0x2ba   : > { %v398_v44 = vadd.f32 %v397_v40, %v394_v42 }
 0x2ef   : > { %v1864_v25 = vpop.f32.mrf.mxu1 }
 0x2f1   : > { %v1305_v26 = vpop.f32.mrf.mxu1 }
 0x2f3   : > { %v563_v27 = vpop.f32.mrf.mxu1 }
 0x2f4   : > { %v568_v28 = vsel %vm300_vm1, %v563_v27, -inf }
 0x2f5   : > { %569 = vmax.xlane.f32.xlu1 %v568_v28  ;;  %v1310_v29 = vpop.f32.mrf.mxu1 }
 0x2f7   : > { %v1867_v30 = vpop.f32.mrf.mxu1 }
 0x2f8   : > { %v771_v31 = vsel %vm300_vm1, %v1867_v30, -inf }
 0x2f9   : > { %772 = vmax.xlane.f32.xlu0 %v771_v31  ;;  %v1320_v32 = vpop.f32.mrf.mxu1 }
 0x2fb   : > { %v1875_v43 = vpop.f32.mrf.mxu1 }
 0x2fc   : > { %v973_v57 = vsel %vm300_vm1, %v1875_v43, -inf }
 0x2fd   : > { %v1330_v45 = vpop.f32.mrf.mxu1 }
 0x37e   : > { %v570_v35 = vpop.xlane.xlu1 %569 }
 0x37f   : > { %v571_v39 = vmax.f32 %v567_v36, %v570_v35 }
 0x381   : > { %v572_v41 = vsub.f32 %v567_v36, %v571_v39  ;;  %691 = vst.msk [vmem:[#allocation2] sm:$0xff] %vm690_vm5, %v571_v39  ;;  %577 = vperm.xlu1 %1425, %v571_v39  }
 0x382   : > { %v773_v46 = vpop.xlane.xlu0 %772 }
 0x383   : > { %v573_v58 = vmul.f32 1.442695, %v572_v41 }
 0x385   : > { %1426 = vset.pattern.permute.xlu1 %v1630_v8 }
 0x386   : > { %483 = vperm.xlu1 %1426, %v398_v44  }
 0x388   : > { %v1878_v47 = vld [vmem:[#allocation2] sm:$0xff] }
 0x389   : > { %v1881_v48 = vmax.f32 %v1878_v47, %v773_v46 }
 0x38a   : > { %1427 = vset.pattern.permute.xlu1 %v1635_v49 }
 0x38b   : > { %893 = vst.msk [vmem:[#allocation2] sm:$0xff] %vm892_vm6, %v1881_v48  ;;  %v775_v23 = vsub.f32 %v1878_v47, %v1881_v48 }
 0x38d   : > { %v776_v24 = vmul.f32 1.442695, %v775_v23 }
 0x392   : > { %v1898_v2 = vld [vmem:[#allocation2] sm:$0xff] }
 0x3fc   : > { %v578_v50 = vpop.permute.xlu1 %577 }
 0x3fd   : > { %v580_v51 = vsub.f32 %v563_v27, %v578_v50 }
 0x3ff   : > { %v581_v52 = vmul.f32 1.442695, %v580_v51 }
 0x401   : > { %1440 = vpow2.f32 %v581_v52  ;;  %v484_v53 = vpop.permute.xlu1 %483 }
 0x402   : > { %486 = vst.msk [vmem:[#allocation3] sm:$0xff] %vm300_vm1, %v484_v53  ;;  %1442 = vpow2.f32 %v573_v58 }
 0x409   : > { %v583_v54 = vld [vmem:[#allocation3] sm:$0xff] }
 0x40a   : > { %585 = vrot.lane.b32.xlu0 %v583_v54, %s1636_s6 }
 0x40e   : > { %v1441_v55 = vpop.eup %1440 }
 0x40f   : > { %v589_v56 = vsel %vm300_vm1, %v1441_v55, 0.0  ;;  %v1894_v60 = vpop.eup %1442 }
 0x410   : > { %590 = vadd.xlane.f32.xlu1 %v589_v56 }
 0x421   : > { %780 = vperm.xlu1 %1427, %v1881_v48  }
 0x425   : > { %1428 = vset.pattern.permute.xlu1 %v1634_v33 }
 0x429   : > { %974 = vmax.xlane.f32.xlu0 %v973_v57 }
 0x43f   : > { %594 = vrot.lane.b32.xlu0 %v1842_v13, %s1631_s18  ;;  %s1643_s18 = smov [#allocation11]  }
 0x440   : > { %s1542_s15 = sshll.u32 %s1643_s18, 4  ;;  %s1543_s15 = int_to_ptr.vmem [resolvable:$false] %s1542_s15 }
 0x441   : > { %s1544_s21 = scalar_lea.vmem %s1543_s15, 256  ;;  %p1545_p4 = scmp.lt.s32.totalorder %s1122_s29, %s1543_s15 }
 0x442   : > { %p1546_p10 = scmp.lt.s32.totalorder %s1544_s21, %s1538_s11 }
 0x444   : > { %p1547_p13 = por %p1546_p10, %p1545_p4 }
 0x446   : > { %p1548_p12 = pnand %p1547_p13, %p1541_p3 }
 0x47c   : > { %v586_v59 = vpop.permute.xlu0 %585 }
 0x47d   : > { %v588_v61 = vmul.f32 %v1894_v60, %v586_v59 }
 0x499   : > { %v591_v62 = vpop.xlane.xlu1 %590 }
 0x49a   : > { %v592_v63 = vadd.f32 %v591_v62, %v588_v61 }
 0x49c   : > { %686 = vperm.xlu1 %1428, %v592_v63  }
 0x49d   : > { %v781_v7 = vpop.permute.xlu1 %780 }
 0x49e   : > { %v783_v9 = vsub.f32 %v1867_v30, %v781_v7 }
 0x4a0   : > { %1429 = vset.pattern.permute.xlu1 %v1637_v1  ;;  %v784_v10 = vmul.f32 1.442695, %v783_v9 }
 0x4a2   : > { %1444 = vpow2.f32 %v784_v10 }
 0x4af   : > { %v1445_v11 = vpop.eup %1444 }
 0x4b0   : > { %v792_v12 = vsel %vm300_vm1, %v1445_v11, 0.0 }
 0x4b2   : > { %v975_v3 = vpop.xlane.xlu0 %974 }
 0x4b3   : > { %v1901_v4 = vmax.f32 %v1898_v2, %v975_v3 }
 0x4b5   : > { %v977_v5 = vsub.f32 %v1898_v2, %v1901_v4  ;;  %1095 = vst.msk [vmem:[#allocation2] sm:$0xff] %vm1094_vm7, %v1901_v4  ;;  %982 = vperm.xlu1 %1429, %v1901_v4  }
 0x4b6   : > { %v595_v6 = vpop.permute.xlu0 %594 }
 0x4b7   : > { %1312 = vmatpush3.msra.mxu0 %v595_v6  ;;  %v978_v41 = vmul.f32 1.442695, %v977_v5 }
 0x4b8   : > { %1314 = vmatmul.mubr.msk.f32.vlgmr.msra.gmra.mxu0 %vm300_vm1, %v1441_v55  ;;  %1321 = vmatprep.subr.mxu0 %v1627_v0 }
 0x4b9   : > { %796 = vrot.lane.b32.xlu1 %v1842_v13, %s1632_s24  ;;  %1323 = vmatprep.mubr.msk.f32.mxu0 %vm1628_vm0, %v1627_v0 }
 0x4ba   : > { %1432 = vset.pattern.permute.xlu1 %v1634_v33 }
 0x4bd   : > { %998 = vrot.lane.b32.xlu1 %v1842_v13, %s1633_s10 }
 0x4e1   : > { %793 = vadd.xlane.f32.xlu1 %v792_v12 }
 0x517   : > { %v687_v14 = vpop.permute.xlu1 %686 }
 0x518   : > { %689 = vst.msk [vmem:[#allocation3] sm:$0xff] %vm682_vm8, %v687_v14 }
 0x51f   : > { %v786_v15 = vld [vmem:[#allocation3] sm:$0xff] }
 0x520   : > { %788 = vrot.lane.b32.xlu0 %v786_v15, %s1638_s1 }
 0x530   : > { %v983_v16 = vpop.permute.xlu1 %982 }
 0x531   : > { %v985_v17 = vsub.f32 %v1875_v43, %v983_v16 }
 0x533   : > { %v986_v13 = vmul.f32 1.442695, %v985_v17 }
 0x534   : > { %v797_v18 = vpop.permute.xlu1 %796 }
 0x535   : > { %1446 = vpow2.f32 %v986_v13  ;;  %1322 = vmatpush3.msra.mxu0 %v797_v18 }
 0x536   : > { %1324 = vmatmul.mubr.msk.f32.vlgmr.msra.gmra.mxu0 %vm300_vm1, %v1445_v11  ;;  %1331 = vmatprep.subr.mxu0 %v1627_v0  ;;  %1448 = vpow2.f32 %v776_v24 }
 0x537   : > { %1333 = vmatprep.mubr.msk.f32.mxu0 %vm1628_vm0, %v1627_v0  ;;  %1450 = vpow2.f32 %v978_v41 }
 0x538   : > { %v999_v19 = vpop.permute.xlu1 %998 }
 0x539   : > { %1332 = vmatpush3.msra.mxu0 %v999_v19 }
 0x542   : > { %v1447_v20 = vpop.eup %1446 }
 0x543   : > { %1334 = vmatmul.mubr.msk.f32.vlgmr.msra.gmra.mxu0 %vm300_vm1, %v1447_v20  ;;  %v1449_v26 = vpop.eup %1448  ;;  %v994_v0 = vsel %vm300_vm1, %v1447_v20, 0.0 }
 0x544   : > { %v1451_v42 = vpop.eup %1450 }
 0x56a   : > { %v794_v29 = vpop.xlane.xlu1 %793 }
 0x578   : > { %v666_v21 = vpop.f32.mrf.mxu0 }
 0x57a   : > { %v1315_v22 = vpop.f32.mrf.mxu0 }
 0x592   : > { %v789_v27 = vpop.permute.xlu0 %788 }
 0x593   : > { %v791_v28 = vmul.f32 %v1449_v26, %v789_v27 }
 0x595   : > { %v795_v30 = vadd.f32 %v794_v29, %v791_v28 }
 0x597   : > { %888 = vperm.xlu0 %1430, %v795_v30  }
 0x59b   : > { %1431 = vset.pattern.permute.xlu0 %v1630_v8 }
 0x5b6   : > { %995 = vadd.xlane.f32.xlu0 %v994_v0 }
 0x5cc   : > { %475 = vperm.xlu0 %1431, %v1872_v37   ;;  %v472_v37 = vld [vmem:[#allocation4] sm:$0xff] }
 0x5d0   : > { %1435 = vset.pattern.permute.xlu0 %v1637_v1 }
 0x5f6   : > { %v868_v31 = vpop.f32.mrf.mxu0 }
 0x5f8   : > { %v1325_v32 = vpop.f32.mrf.mxu0 }
 0x603   : > { %v1070_v33 = vpop.f32.mrf.mxu0 }
 0x605   : > { %v1335_v34 = vpop.f32.mrf.mxu0 }
 0x612   : > { %v889_v35 = vpop.permute.xlu0 %888 }
 0x613   : > { %891 = vst.msk [vmem:[#allocation3] sm:$0xff] %vm884_vm9, %v889_v35 }
 0x61a   : > { %v988_v36 = vld [vmem:[#allocation3] sm:$0xff] }
 0x61b   : > { %990 = vrot.lane.b32.xlu1 %v988_v36, %s1639_s7 }
 0x61f   : > { %673 = vperm.xlu1 %1432, %v1894_v60  }
 0x623   : > { %678 = vrot.lane.b32.xlu1 %v666_v21, %s1640_s19 }
 0x624   : > { %1433 = vset.pattern.permute.xlu1 %v1635_v49 }
 0x627   : > { %875 = vperm.xlu1 %1433, %v1449_v26  }
 0x62b   : > { %1434 = vset.pattern.permute.xlu1 %v1637_v1 }
 0x63f   : > { %v996_v8 = vpop.xlane.xlu0 %995 }
 0x647   : > { %v476_v38 = vpop.permute.xlu0 %475 }
 0x648   : > { %v478_v39 = vmul.f32 %v476_v38, %v472_v37 }
 0x64a   : > { %v479_v40 = vadd.f32 %v478_v39, %v1864_v25 }
 0x64c   : > { %480 = vst.msk [vmem:[#allocation4] sm:$0xff] %vm300_vm1, %v479_v40 }
 0x653   : > { %v670_v47 = vld [vmem:[#allocation4] sm:$0xff] }
 0x68d   : > { %v991_v43 = vpop.permute.xlu1 %990 }
 0x68e   : > { %v993_v44 = vmul.f32 %v1451_v42, %v991_v43 }
 0x690   : > { %v997_v45 = vadd.f32 %v996_v8, %v993_v44 }
 0x692   : > { %1090 = vperm.xlu1 %1434, %v997_v45  }
 0x696   : > { %880 = vrot.lane.b32.xlu1 %v868_v31, %s1641_s22 }
 0x69a   : > { %v674_v46 = vpop.permute.xlu1 %673  ;;  %1077 = vperm.xlu1 %1434, %v1451_v42  }
 0x69b   : > { %v676_v48 = vmul.f32 %v674_v46, %v670_v47 }
 0x69e   : > { %v679_v49 = vpop.permute.xlu1 %678  ;;  %1082 = vrot.lane.b32.xlu1 %v1070_v33, %s1642_s16 }
 0x69f   : > { %v681_v25 = vadd.f32 %v679_v49, %v676_v48 }
 0x6a1   : > { %683 = vst.msk [vmem:[#allocation4] sm:$0xff] %vm682_vm8, %v681_v25 }
 0x6a2   : > { %v876_v50 = vpop.permute.xlu1 %875 }
 0x6a8   : > { %v872_v51 = vld [vmem:[#allocation4] sm:$0xff] }
 0x6a9   : > { %v878_v53 = vmul.f32 %v876_v50, %v872_v51 }
 0x70d   : > { %v1091_v52 = vpop.permute.xlu1 %1090 }
 0x70e   : > { %1093 = vst.msk [vmem:[#allocation3] sm:$0xff] %vm1086_vm10, %v1091_v52 }
 0x711   : > { %v881_v54 = vpop.permute.xlu1 %880 }
 0x712   : > { %v883_v55 = vadd.f32 %v881_v54, %v878_v53 }
 0x714   : > { %885 = vst.msk [vmem:[#allocation4] sm:$0xff] %vm884_vm9, %v883_v55 }
 0x715   : > { %v1100_v56 = vld [vmem:[#allocation3] sm:$0xff]  ;;  %v1078_v58 = vpop.permute.xlu1 %1077 }
 0x716   : > { %v1101_v57 = vadd.f32 1e-06, %v1100_v56 }
 0x718   : > { %1452 = vrcp.f32 %v1101_v57 }
 0x719   : > { %v1083_v61 = vpop.permute.xlu1 %1082 }
 0x71b   : > { %v1074_v59 = vld [vmem:[#allocation4] sm:$0xff] }
 0x71c   : > { %v1080_v60 = vmul.f32 %v1078_v58, %v1074_v59 }
 0x71e   : > { %v1085_v62 = vadd.f32 %v1083_v61, %v1080_v60 }
 0x720   : > { %1087 = vst.msk [vmem:[#allocation4] sm:$0xff] %vm1086_vm10, %v1085_v62 }
 0x725   : > { %v1453_v63 = vpop.eup %1452 }
 0x727   : > { %v1099_v1 = vld [vmem:[#allocation4] sm:$0xff] }
 0x728   : > { %v1103_v2 = vmul.f32 %v1453_v63, %v1099_v1 }
 0x72a   : > { %1105 = vst.msk [vmem:[%s286_s20] sm:$0xff] %vm293_vm3, %v1103_v2 }
 0x72b   : > { %1551 = shalt.err (!%p1548_p12)
}
 0x72c   : > { %s1552_s24 = scalar_lea.hbm %s1119_s28, 128  ;;  %s1556_s10 = scalar_lea.hbm %s1989_s3, 256 }
 0x72d   : > { %p1553_p1 = scmp.ne.s32.totalorder %s1119_s28, %s1552_s24  ;;  %p1557_p6 = scmp.lt.s32.totalorder %s1119_s28, %s1989_s3 }
 0x72e   : > { %p1558_p7 = scmp.lt.s32.totalorder %s1556_s10, %s1552_s24 }
 0x72f   : > { %p1554_p2 = pnand %p1553_p1, %p1719_p9 }
 0x730   : > { %p1559_p8 = por %p1558_p7, %p1557_p6 }
 0x731   : > { %p1555_p5 = pneg %p1554_p2 }
 0x733   : > { %p1560_p0 = pnand %p1559_p8, %p1555_p5 }
 0x735   : > { %1563 = shalt.err (!%p1560_p0)
}
 0x736   : > { %1342 = dma.vmem_to_hbm [thread:$0]  (%p1719_p9), %s1122_s29, 128, %s1119_s28, %s1107_s30  }
 0x737 PF: > { %s1133_s7 = sand.u32 1, %s1602_s12   ;;  %p2004_p3 = scmp.ge.s32.totalorder %s1622_s17, 2 }
 0x738   : > { %s1134_s19 = scalar_lea.sflag [#allocation7], %s1133_s7 }
 0x739   : > { %p1355_p4 = pnand %p2004_p3, %p1726_p11 }
 0x73b   : > { %p1356_p10 = pneg %p1355_p4 }
 0x73d   : > { %1597 = dma.done.wait (%p1356_p10), %s1134_s19, 128  }
 0x73e   : > { %1599 = vsyncadd (%p1356_p10), %s1134_s19, 4294967168  ;;  %s22_s17 = sadd.s32 1, %s1622_s17   ;;  %s2005_s15 = sld [smem:[#allocation15_spill]] }
 0x73f   : > { %p19_p13 = scmp.ge.s32.totalorder %s22_s17, 4   ;;  %s2006_s16 = sld [smem:[#allocation16_spill]] }
 0x740   : > { %s2007_s12 = smov %s1606_s13  ;;  %s2008_s13 = smov %s1610_s14 }
 0x741   : > { %s2009_s14 = smov %s1724_s26  ;;  %21 = sbr.rel (!%p19_p13) target bundleno = 10 (0xa), region = 109 }
 0x746   :  { %1139 = vsyncpa [#allocation6], 1 }
 0x747   :  { %1141 = vsyncpa [#allocation6 + $0x1], 1 }
 0x748   :  { %1142 = vsyncpa [#allocation9], 1 }
 0x749   :  { %1144 = vsyncpa [#allocation9 + $0x1], 1 }
 0x74a   :  { %1145 = vsyncpa [#allocation7], 1 }
 0x74b   :  { %1147 = vsyncpa [#allocation7 + $0x1], 1 }

</bundles_post_ra>
